<compile_context>
chip_gen: v7x
topology: tpu7x:2x2x1
jax: 0.10.0
libtpu: 0.0.40
codegen_flags: <defaults>
</compile_context>

<pallas_src>
import functools

import jax
import jax.numpy as jnp
from jax.experimental import pallas as pl
from jax.experimental.pallas import tpu as pltpu


# ---------------------------------------------------------------------------
# Branch-specialized kernels (selected at trace time; no in-kernel gating).
# ---------------------------------------------------------------------------
def _true_kernel(x_ref, o_ref):
    # True_fn(): relu(x * 2 + 1)   -- pure VPU work
    o_ref[...] = jnp.maximum(x_ref[...] * 2.0 + 1.0, 0.0)


def _false_kernel(x_ref, o_ref):
    # False_fn(): tanh(x) - 0.5    -- tanh goes to the EUP, kept in f32
    o_ref[...] = jnp.tanh(x_ref[...]) - 0.5


def _branch_pallas(x: jax.Array, *, pred: bool) -> jax.Array:
    """Single-block elementwise Pallas call, specialized on the static pred."""
    kernel = _true_kernel if pred else _false_kernel
    M, N = x.shape
    return pl.pallas_call(
        kernel,
        out_shape=jax.ShapeDtypeStruct((M, N), x.dtype),
        grid=(1,),
        in_specs=[pl.BlockSpec((M, N), lambda i: (0, 0))],
        out_specs=pl.BlockSpec((M, N), lambda i: (0, 0)),
        compiler_params=pltpu.CompilerParams(
            dimension_semantics=("arbitrary",)
        ),
    )(x)


def _make_branch_fn(pred: bool, x: jax.Array):
    """Build a zero-arg callable (like the PyTorch True_fn/False_fn) that
    closes over `x` and runs the branch-specialized, jit-cached Pallas kernel."""
    jitted = jax.jit(functools.partial(_branch_pallas, pred=pred))
    return lambda: jitted(x)


# ---------------------------------------------------------------------------
# Module-equivalent wrapper (mirrors the PyTorch signature and forward).
# ---------------------------------------------------------------------------
class Cond:
    """JAX/Pallas equivalent of the PyTorch Cond module."""

    def __init__(self, pred, True_fn, False_fn):
        self.pred = bool(pred)
        self.True_fn = True_fn
        self.False_fn = False_fn

    def __call__(self) -> jax.Array:
        # Static Python-level branch, exactly as in the PyTorch module.
        if self.pred:
            return self.True_fn()
        return self.False_fn()


# Pure-JAX reference for correctness checking.
def _cond_ref(pred: bool, x: jax.Array) -> jax.Array:
    if pred:
        return jnp.maximum(x * 2.0 + 1.0, 0.0)
    return jnp.tanh(x) - 0.5


if __name__ == "__main__":
    key = jax.random.PRNGKey(0)
    # Deterministic "parameter" the branch functions close over.
    x = jax.random.normal(key, (16, 128), dtype=jnp.float32)

    ok = True
    for pred in (True, False):
        true_fn = _make_branch_fn(True, x)
        false_fn = _make_branch_fn(False, x)
        mod = Cond(pred, true_fn, false_fn)

        out = jax.block_until_ready(mod())
        # Second call reuses the cached jitted executable (no re-trace).
        out2 = jax.block_until_ready(mod())

        ref = _cond_ref(pred, x)
        if out.shape != ref.shape or out.dtype != ref.dtype:
            ok = False
        if not jnp.allclose(out, ref, atol=1e-5, rtol=1e-5):
            ok = False
        if not jnp.allclose(out2, ref, atol=1e-5, rtol=1e-5):
            ok = False

    if ok:
        print("KERNEL_OK")
    else:
        print("KERNEL_MISMATCH")
</pallas_src>

<mosaic_0001>
module attributes {stable_mosaic.version = 11 : i64} {
  func.func @_true_kernel(%arg0: i32, %arg1: memref<16x128xf32, #tpu.memory_space<vmem>>, %arg2: memref<16x128xf32, #tpu.memory_space<vmem>>) attributes {dimension_semantics = [#tpu.dimension_semantics<arbitrary>], iteration_bounds = array<i64: 1>, scalar_prefetch = 0 : i64, scratch_operands = 0 : i64, tpu.core_type = #tpu.core_type<tc>, window_params = [{pipeline_mode = #tpu.pipeline_mode<synchronous>, transform_indices = @transform_0, window_bounds = array<i64: 16, 128>}, {pipeline_mode = #tpu.pipeline_mode<synchronous>, transform_indices = @transform_1, window_bounds = array<i64: 16, 128>}]} {
    %c0 = arith.constant 0 : index
    %c0_0 = arith.constant 0 : index
    %0 = vector.load %arg1[%c0, %c0_0] : memref<16x128xf32, #tpu.memory_space<vmem>>, vector<16x128xf32>
    %cst = arith.constant 2.000000e+00 : f32
    %1 = vector.broadcast %cst : f32 to vector<16x128xf32>
    %2 = arith.mulf %0, %1 : vector<16x128xf32>
    %cst_1 = arith.constant 1.000000e+00 : f32
    %3 = vector.broadcast %cst_1 : f32 to vector<16x128xf32>
    %4 = arith.addf %2, %3 : vector<16x128xf32>
    %cst_2 = arith.constant 0.000000e+00 : f32
    %5 = vector.broadcast %cst_2 : f32 to vector<16x128xf32>
    %6 = arith.maximumf %4, %5 : vector<16x128xf32>
    %c0_3 = arith.constant 0 : index
    %c0_4 = arith.constant 0 : index
    %7 = vector.load %arg2[%c0_3, %c0_4] : memref<16x128xf32, #tpu.memory_space<vmem>>, vector<16x128xf32>
    tpu.vector_store %arg2[%c0_3, %c0_4], %6 {strides = array<i32>} : memref<16x128xf32, #tpu.memory_space<vmem>>, vector<16x128xf32>,
    return
  }
  func.func @transform_0(%arg0: i32) -> (i32, i32) {
    %c0_i32 = arith.constant 0 : i32
    %c0_i32_0 = arith.constant 0 : i32
    %c0_i32_1 = arith.constant 0 : i32
    return %c0_i32, %c0_i32_0 : i32, i32
  }
  func.func @transform_1(%arg0: i32) -> (i32, i32) {
    %c0_i32 = arith.constant 0 : i32
    %c0_i32_0 = arith.constant 0 : i32
    %c0_i32_1 = arith.constant 0 : i32
    return %c0_i32, %c0_i32_0 : i32, i32
  }
}

</mosaic_0001>

<bundles_post_ra>
// kernel: _branch_pallas.1
= control target key start
LH: loop header
LB: loop body
LE: loop exit
PB: predicated region body
PF: predicated region fallthrough
CT: control target
= control target key end

     0   :  { %6 = vsyncpa [#allocation3], 0  ;;  %s146_s0 = inlined_call_operand.hbm [shape: f32[16,128], index: 0, kind: input, shape index: {}]   ;;  %s147_s1 = inlined_call_operand.hbm [shape: f32[16,128], index: 1, kind: output, shape index: {}]  }
   0x1   :  { %7 = vsyncpa [#allocation4], 0  ;;  %s102_s6 = smov [#allocation2]   ;;  %s54_s10 = scalar_lea.hbm %s146_s0, 256 }
   0x2   :  { %s13_s7 = sshll.u32 %s102_s6, 4  ;;  %p55_p0 = scmp.ne.s32.totalorder %s146_s0, %s54_s10  ;;  %s14_s7 = int_to_ptr.vmem [resolvable:$true] %s13_s7 }
   0x3   :  { %p58_p1 = scmp.lt.u32.totalorder %s54_s10, %s146_s0 }
   0x5   :  { %p60_p2 = pnand %p58_p1, %p55_p0 }
   0x7   :  { %63 = shalt.err (!%p60_p2)
}
   0x8   :  { %s64_s15 = scalar_lea.vmem %s14_s7, 256  ;;  %p69_p4 = scmp.lt.s32.totalorder %s14_s7, %s14_s7 }
   0x9   :  { %p65_p3 = scmp.ne.s32.totalorder %s14_s7, %s64_s15  ;;  %p70_p5 = scmp.lt.s32.totalorder %s64_s15, %s64_s15 }
   0xb   :  { %p71_p6 = por %p70_p5, %p69_p4 }
   0xd   :  { %p72_p7 = pnand %p71_p6, %p65_p3 }
   0xf   :  { %75 = shalt.err (!%p72_p7)
}
  0x10   :  { %s103_s16 = smov 128   ;;  %s104_s17 = smov 8  }
  0x11   :  { %19 = dma.hbm_to_vmem [thread:$0]  %s146_s0, 256, %s14_s7, [#allocation3], %s103_s16, %s103_s16, %s104_s17  }
  0x12   :  { %98 = dma.done.wait [#allocation3], 256  }
  0x13   :  { %99 = vsyncadd [#allocation3], 4294967040  ;;  %v23_v0 = vld [vmem:[#allocation2] sm:$0xff]  ;;  %v24_v1 = vld [vmem:[#allocation2 + $0x8] sm:$0xff]  ;;  %s105_s20 = smov [#allocation5]  }
  0x14   :  { %v25_v2 = vmul.f32 2.0, %v23_v0  ;;  %v26_v3 = vmul.f32 2.0, %v24_v1  ;;  %s38_s21 = sshll.u32 %s105_s20, 4  ;;  %s39_s21 = int_to_ptr.vmem [resolvable:$true] %s38_s21 }
  0x15   :  { %s76_s22 = scalar_lea.vmem %s39_s21, 256  ;;  %p81_p9 = scmp.lt.s32.totalorder %s39_s21, %s39_s21 }
  0x16   :  { %v27_v4 = vadd.f32 1.0, %v25_v2  ;;  %v28_v5 = vadd.f32 1.0, %v26_v3  ;;  %p77_p8 = scmp.ne.s32.totalorder %s39_s21, %s76_s22  ;;  %p82_p10 = scmp.lt.s32.totalorder %s76_s22, %s76_s22 }
  0x18   :  { %v29_v6 = vmax.f32 %v27_v4, 0.0  ;;  %v30_v7 = vmax.f32 %v28_v5, 0.0  ;;  %p83_p11 = por %p82_p10, %p81_p9 }
  0x1a   :  { %31 = vst [vmem:[#allocation5] sm:$0xff] %v29_v6  ;;  %32 = vst [vmem:[#allocation5 + $0x8] sm:$0xff] %v30_v7  ;;  %p84_p12 = pnand %p83_p11, %p77_p8 }
  0x1c   :  { %87 = shalt.err (!%p84_p12)
}
  0x1d   :  { %s88_s24 = scalar_lea.hbm %s147_s1, 256 }
  0x1e   :  { %p89_p13 = scmp.ne.s32.totalorder %s147_s1, %s88_s24  ;;  %p92_p0 = scmp.lt.u32.totalorder %s88_s24, %s147_s1 }
  0x20   :  { %p94_p1 = pnand %p92_p0, %p89_p13 }
  0x22   :  { %97 = shalt.err (!%p94_p1)
}
  0x23   :  { %44 = dma.vmem_to_hbm [thread:$0]  %s39_s21, 256, %s147_s1, [#allocation4], %s103_s16, %s103_s16, %s104_s17  }
  0x24   :  { %100 = dma.done.wait [#allocation4], 256  }
  0x25   :  { %101 = vsyncadd [#allocation4], 4294967040 }
  0x26   :  { %48 = vsyncpa [#allocation3], 1 }
  0x27   :  { %49 = vsyncpa [#allocation4], 1 }

</bundles_post_ra>
